<compile_context>
chip_gen: v5e
topology: v5e:2x2
jax: 0.10.0
libtpu: 0.0.40
codegen_flags: <defaults>
</compile_context>

<pallas_src>
import functools

import jax
import jax.numpy as jnp
from jax import lax
from jax.experimental import pallas as pl
from jax.experimental.pallas import tpu as pltpu


_BT = 8            # batches per grid step (Gram waste grows as (7*BT)^2)
_NSCAL = 17        # per-batch scalars: R(9), t(3), fu, fv, cu, cv, dmean
_SCAL_LANES = 128  # scalar row padded to a full lane group
_CK_MAX = 2048     # max lanes per N-chunk (bounds VMEM + vreg pressure)


def _derivative_kernel(n_true, scal_ref, stream_ref, out_ref, slab):
    k = pl.program_id(1)
    bt = scal_ref.shape[0]
    ck = slab.shape[-1]

    lane = lax.broadcasted_iota(jnp.int32, (1, ck), 1)
    in_range = (k * ck + lane) < n_true          # (1, ck), broadcasts over bt

    def sc(i):                                   # per-batch scalar -> (bt, 1)
        return scal_ref[:, i:i + 1]

    r00, r01, r02 = sc(0), sc(1), sc(2)
    r10, r11, r12 = sc(3), sc(4), sc(5)
    r20, r21, r22 = sc(6), sc(7), sc(8)
    t0, t1, t2 = sc(9), sc(10), sc(11)
    fu, fv, cu, cv = sc(12), sc(13), sc(14), sc(15)
    dmean = sc(16)

    # Plane-major streamed inputs, each a full (bt, ck) tile-aligned slab.
    nx = stream_ref[0, 0, :, :]
    ny = stream_ref[0, 1, :, :]
    u0 = stream_ref[0, 2, :, :]
    v0 = stream_ref[0, 3, :, :]
    px = stream_ref[0, 4, :, :]
    py = stream_ref[0, 5, :, :]
    pz = stream_ref[0, 6, :, :]
    sw = stream_ref[0, 7, :, :]                  # sqrt(valid * uncertainty)

    # centers_in_view = R @ p + t  (componentwise, batch-vectorized)
    x = r00 * px + r01 * py + r02 * pz + t0
    y = r10 * px + r11 * py + r12 * pz + t1
    z = r20 * px + r21 * py + r22 * pz + t2
    z = jnp.where(in_range, z, 1.0)              # keep padded lanes finite

    rcp = pl.reciprocal(z, approx=True)          # EUP slot
    z_inv = rcp * (2.0 - z * rcp)                # one Newton step -> f32 acc.

    fu_z = fu * z_inv
    fv_z = fv * z_inv
    xfu_z = x * fu_z
    yfv_z = y * fv_z
    delta = nx * (xfu_z + cu - u0) + ny * (yfv_z + cv - v0)

    dcx = nx * fu_z
    dcy = ny * fv_z
    dcz = -(nx * xfu_z + ny * yfv_z) * z_inv

    # d(delta_cs)/d(translation) = ddelta_cs_dcenter @ R
    dt0 = dcx * r00 + dcy * r10 + dcz * r20
    dt1 = dcx * r01 + dcy * r11 + dcz * r21
    dt2 = dcx * r02 + dcy * r12 + dcz * r22
    # d(delta_cs)/d(rotation) = d/d(translation) @ (-skew(p_body))
    dr0 = dt2 * py - dt1 * pz
    dr1 = dt0 * pz - dt2 * px
    dr2 = dt1 * px - dt0 * py

    # Component-major operand slab: rows [c*bt : (c+1)*bt] = component c of
    # all bt batches (7 full-width stores, no single-sublane vst.msk).
    slab[0 * bt:1 * bt, :] = dr0 * sw
    slab[1 * bt:2 * bt, :] = dr1 * sw
    slab[2 * bt:3 * bt, :] = dr2 * sw
    slab[3 * bt:4 * bt, :] = dt0 * sw
    slab[4 * bt:5 * bt, :] = dt1 * sw
    slab[5 * bt:6 * bt, :] = dt2 * sw
    slab[6 * bt:7 * bt, :] = (dmean - delta) * sw

    sl = slab[...]
    gram = lax.dot_general(sl, sl, (((1,), (1,)), ((), ())),
                           preferred_element_type=jnp.float32)

    @pl.when(k == 0)
    def _init():
        out_ref[...] = jnp.zeros_like(out_ref)

    out_ref[0, :, :] += gram                     # accumulate across N-chunks


class DerivativeCalculator:
    """Pallas-TPU implementation of the PyTorch DerivativeCalculator forward."""

    def __init__(self, alternative_optimizing, distribution_length,
                 distribution_length_plus_1_half, learning_rate):
        self.alternative_optimizing = alternative_optimizing
        self.distribution_length = distribution_length
        self.distribution_length_plus_1_half = distribution_length_plus_1_half
        self.learning_rate = learning_rate

    def __call__(self, normals_in_image, centers_in_image, centers_in_body,
                 deformed_body2view_pose_data, camera_data, valid_data_line,
                 distributions, distribution_mean, distribution_uncertainties,
                 it=0):
        if self.alternative_optimizing and (it % 2 != 0):
            # TODO(synk): odd-iteration histogram branch (torch.gather over
            # `distributions`) is a per-lane gather; not reached by the default
            # forward (it=0) and left unimplemented here.
            raise NotImplementedError("alternative_optimizing odd-iteration branch")

        f32 = jnp.float32
        B, N, _ = normals_in_image.shape
        bt = _BT
        b_pad = ((B + bt - 1) // bt) * bt
        nsteps = b_pad // bt

        n128 = max(128, ((N + 127) // 128) * 128)
        ck = min(n128, _CK_MAX)
        n_pad = ((n128 + ck - 1) // ck) * ck
        kchunks = n_pad // ck

        # ----- streamed per-lane planes (one packed plane-major array) -----
        valid_f = valid_data_line.astype(f32)
        dunc_f = distribution_uncertainties.astype(f32)
        sw = jnp.sqrt(valid_f * dunc_f)                       # fold valid in

        nx = normals_in_image[..., 0].astype(f32)
        ny = normals_in_image[..., 1].astype(f32)
        u0 = centers_in_image[..., 0].astype(f32)
        v0 = centers_in_image[..., 1].astype(f32)
        px = centers_in_body[..., 0].astype(f32)
        py = centers_in_body[..., 1].astype(f32)
        pz = centers_in_body[..., 2].astype(f32)

        stream = jnp.stack([nx, ny, u0, v0, px, py, pz, sw], axis=1)  # (B,8,N)
        stream = jnp.pad(stream, ((0, b_pad - B), (0, 0), (0, n_pad - N)))
        stream = stream.reshape(nsteps, bt, 8, n_pad).transpose(0, 2, 1, 3)
        # -> (nsteps, 8 planes, bt, n_pad)

        # ----- per-batch scalars, VMEM-blocked -----
        # TODO(synk): a per-line (B, N) distribution_mean would need its own
        # lane plane; scalar / per-batch means are handled here.
        dm = jnp.asarray(distribution_mean, f32)
        dmean_b = jnp.broadcast_to(dm.reshape(-1), (B,))
        pose = deformed_body2view_pose_data.astype(f32).reshape(B, 12)
        cam = camera_data.astype(f32).reshape(B, -1)
        scal = jnp.concatenate([pose, cam[:, 2:6], dmean_b[:, None]], axis=-1)
        if b_pad > B:
            # Padded batches: t2 = 1 keeps z finite (sw is zero there anyway).
            pad_rows = jnp.zeros((b_pad - B, _NSCAL), f32).at[:, 11].set(1.0)
            scal = jnp.concatenate([scal, pad_rows], axis=0)
        scal = jnp.pad(scal, ((0, 0), (0, _SCAL_LANES - _NSCAL)))  # (b_pad,128)

        kernel = functools.partial(_derivative_kernel, N)

        packed = pl.pallas_call(
            kernel,
            out_shape=jax.ShapeDtypeStruct((nsteps, 7 * bt, 7 * bt), f32),
            grid=(nsteps, kchunks),
            in_specs=[
                pl.BlockSpec((bt, _SCAL_LANES), lambda s, k: (s, 0)),
                pl.BlockSpec((1, 8, bt, ck), lambda s, k: (s, 0, 0, k)),
            ],
            out_specs=pl.BlockSpec((1, 7 * bt, 7 * bt), lambda s, k: (s, 0, 0)),
            scratch_shapes=[pltpu.VMEM((7 * bt, ck), f32)],
            compiler_params=pltpu.CompilerParams(
                dimension_semantics=("parallel", "arbitrary")),
        )(scal, stream)

        # Extract per-batch diagonal 7x7 blocks of each step's 56x56 Gram.
        g5 = packed.reshape(nsteps, 7, bt, 7, bt)
        diag = jnp.diagonal(g5, axis1=2, axis2=4)          # (nsteps, 7, 7, bt)
        per_batch = jnp.moveaxis(diag, -1, 1).reshape(b_pad, 7, 7)

        gradient = per_batch[:B, 6, :6][..., None]          # (B, 6, 1)
        hessian = per_batch[:B, :6, :6]                     # (B, 6, 6)
        return gradient, hessian


# ------------------------- pure-JAX reference -------------------------------
def _skew(v):
    z = jnp.zeros_like(v[..., 0])
    M = jnp.stack([z, -v[..., 2], v[..., 1],
                   v[..., 2], z, -v[..., 0],
                   -v[..., 1], v[..., 0], z], axis=-1)
    return M.reshape(v.shape[:-1] + (3, 3))


def _reference(normals, cimg, cbody, pose, cam, valid, dmean, dunc):
    R = pose[:, :9].reshape(-1, 3, 3)
    t = pose[:, 9:]
    civ = jnp.einsum("bnj,bij->bni", cbody, R) + t[:, None, :]
    x, y, z = civ[..., 0], civ[..., 1], civ[..., 2]
    fu = cam[:, 2:3]; fv = cam[:, 3:4]; cu = cam[:, 4:5]; cv = cam[:, 5:6]
    fu_z = fu / z; fv_z = fv / z
    xfu_z = x * fu_z; yfv_z = y * fv_z
    u = xfu_z + cu; v = yfv_z + cv
    delta = normals[..., 0] * (u - cimg[..., 0]) + normals[..., 1] * (v - cimg[..., 1])
    dll = (dmean - delta) * dunc
    dcx = normals[..., 0] * fu_z
    dcy = normals[..., 1] * fv_z
    dcz = (-normals[..., 0] * xfu_z - normals[..., 1] * yfv_z) / z
    dc = jnp.stack([dcx, dcy, dcz], axis=-1)[..., None, :]          # (B,N,1,3)
    Rb = jnp.broadcast_to(R[:, None], (R.shape[0], dc.shape[1], 3, 3))
    dtrans = dc @ Rb
    drot = dtrans @ (-_skew(cbody))
    theta = jnp.concatenate([drot, dtrans], axis=-1)[..., 0, :]     # (B,N,6)
    grads = dll[..., None] * theta
    theta1 = (theta * jnp.sqrt(dunc)[..., None])[..., None]
    hess = theta1 @ jnp.swapaxes(theta1, -1, -2)
    vf = valid.astype(jnp.float32)
    grads = grads * vf[..., None]
    hess = hess * vf[..., None, None]
    return grads.sum(1)[..., None], hess.sum(1)


if __name__ == "__main__":
    B, N, L = 2, 100, 11
    key = jax.random.PRNGKey(0)
    keys = jax.random.split(key, 8)

    # deterministic synthetic inputs
    raw = jax.random.normal(keys[0], (B, 3, 3), jnp.float32)
    R, _ = jnp.linalg.qr(raw)                                # per-batch 3x3 "rotation"
    t = jnp.concatenate([jax.random.uniform(keys[1], (B, 2), jnp.float32, -0.2, 0.2),
                         jnp.full((B, 1), 4.0, jnp.float32)], axis=-1)
    pose = jnp.concatenate([R.reshape(B, 9), t], axis=-1)    # (B, 12)

    camera = jnp.tile(jnp.array([[128.0, 128.0, 150.0, 160.0, 64.0, 60.0]],
                                jnp.float32), (B, 1))        # (B, 6)

    normals = jax.random.normal(keys[2], (B, N, 2), jnp.float32)
    normals = normals / (jnp.linalg.norm(normals, axis=-1, keepdims=True) + 1e-6)
    centers_img = jax.random.uniform(keys[3], (B, N, 2), jnp.float32, 0.0, 128.0)
    centers_body = jax.random.uniform(keys[4], (B, N, 3), jnp.float32, -0.5, 0.5)
    valid = jax.random.bernoulli(keys[5], 0.8, (B, N))
    distributions = jax.random.uniform(keys[6], (B, N, L), jnp.float32, 1e-4, 1.0)
    distribution_mean = jnp.float32(0.3)
    distribution_unc = jax.random.uniform(keys[7], (B, N), jnp.float32, 0.5, 1.5)

    model = DerivativeCalculator(alternative_optimizing=False,
                                 distribution_length=L,
                                 distribution_length_plus_1_half=(L + 1) / 2.0,
                                 learning_rate=1.3)

    grad, hess = model(normals, centers_img, centers_body, pose, camera,
                       valid, distributions, distribution_mean,
                       distribution_unc, it=0)
    jax.block_until_ready((grad, hess))

    g_ref, h_ref = _reference(normals, centers_img, centers_body, pose, camera,
                              valid, jnp.broadcast_to(distribution_mean, (B, N)),
                              distribution_unc)

    def rel_err(a, b):
        return float(jnp.max(jnp.abs(a - b)) / (jnp.max(jnp.abs(b)) + 1e-6))

    assert grad.shape == (B, 6, 1) and hess.shape == (B, 6, 6)
    assert rel_err(grad, g_ref) < 1e-3, rel_err(grad, g_ref)
    assert rel_err(hess, h_ref) < 1e-3, rel_err(hess, h_ref)

    print("KERNEL_OK")
</pallas_src>

<mosaic_0001>
module attributes {stable_mosaic.version = 11 : i64} {
  func.func @_derivative_kernel(%arg0: i32, %arg1: i32, %arg2: memref<8x128xf32, #tpu.memory_space<vmem>>, %arg3: memref<1x8x8x128xf32, #tpu.memory_space<vmem>>, %arg4: memref<1x56x56xf32, #tpu.memory_space<vmem>>, %arg5: memref<56x128xf32, #tpu.memory_space<vmem>>) attributes {dimension_semantics = [#tpu.dimension_semantics<parallel>, #tpu.dimension_semantics<arbitrary>], iteration_bounds = array<i64: 1, 1>, scalar_prefetch = 0 : i64, scratch_operands = 1 : i64, tpu.core_type = #tpu.core_type<tc>, window_params = [{transform_indices = @transform_0, window_bounds = array<i64: 8, 128>}, {transform_indices = @transform_1, window_bounds = array<i64: 1, 8, 8, 128>}, {transform_indices = @transform_2, window_bounds = array<i64: 1, 56, 56>}]} {
    %0 = tpu.iota {dimensions = array<i32: 1>} : vector<1x128xi32>
    %c128_i32 = arith.constant 128 : i32
    %1 = arith.muli %arg1, %c128_i32 : i32
    %2 = vector.broadcast %1 : i32 to vector<1x128xi32>
    %3 = arith.addi %2, %0 : vector<1x128xi32>
    %c100_i32 = arith.constant 100 : i32
    %4 = vector.broadcast %c100_i32 : i32 to vector<1x128xi32>
    %5 = arith.cmpi slt, %3, %4 : vector<1x128xi32>
    %c0 = arith.constant 0 : index
    %c0_0 = arith.constant 0 : index
    %6 = vector.load %arg2[%c0, %c0_0] : memref<8x128xf32, #tpu.memory_space<vmem>>, vector<8x1xf32>
    %c0_1 = arith.constant 0 : index
    %c1 = arith.constant 1 : index
    %7 = vector.load %arg2[%c0_1, %c1] : memref<8x128xf32, #tpu.memory_space<vmem>>, vector<8x1xf32>
    %c0_2 = arith.constant 0 : index
    %c2 = arith.constant 2 : index
    %8 = vector.load %arg2[%c0_2, %c2] : memref<8x128xf32, #tpu.memory_space<vmem>>, vector<8x1xf32>
    %c0_3 = arith.constant 0 : index
    %c3 = arith.constant 3 : index
    %9 = vector.load %arg2[%c0_3, %c3] : memref<8x128xf32, #tpu.memory_space<vmem>>, vector<8x1xf32>
    %c0_4 = arith.constant 0 : index
    %c4 = arith.constant 4 : index
    %10 = vector.load %arg2[%c0_4, %c4] : memref<8x128xf32, #tpu.memory_space<vmem>>, vector<8x1xf32>
    %c0_5 = arith.constant 0 : index
    %c5 = arith.constant 5 : index
    %11 = vector.load %arg2[%c0_5, %c5] : memref<8x128xf32, #tpu.memory_space<vmem>>, vector<8x1xf32>
    %c0_6 = arith.constant 0 : index
    %c6 = arith.constant 6 : index
    %12 = vector.load %arg2[%c0_6, %c6] : memref<8x128xf32, #tpu.memory_space<vmem>>, vector<8x1xf32>
    %c0_7 = arith.constant 0 : index
    %c7 = arith.constant 7 : index
    %13 = vector.load %arg2[%c0_7, %c7] : memref<8x128xf32, #tpu.memory_space<vmem>>, vector<8x1xf32>
    %c0_8 = arith.constant 0 : index
    %c8 = arith.constant 8 : index
    %14 = vector.load %arg2[%c0_8, %c8] : memref<8x128xf32, #tpu.memory_space<vmem>>, vector<8x1xf32>
    %c0_9 = arith.constant 0 : index
    %c9 = arith.constant 9 : index
    %15 = vector.load %arg2[%c0_9, %c9] : memref<8x128xf32, #tpu.memory_space<vmem>>, vector<8x1xf32>
    %c0_10 = arith.constant 0 : index
    %c10 = arith.constant 10 : index
    %16 = vector.load %arg2[%c0_10, %c10] : memref<8x128xf32, #tpu.memory_space<vmem>>, vector<8x1xf32>
    %c0_11 = arith.constant 0 : index
    %c11 = arith.constant 11 : index
    %17 = vector.load %arg2[%c0_11, %c11] : memref<8x128xf32, #tpu.memory_space<vmem>>, vector<8x1xf32>
    %c0_12 = arith.constant 0 : index
    %c12 = arith.constant 12 : index
    %18 = vector.load %arg2[%c0_12, %c12] : memref<8x128xf32, #tpu.memory_space<vmem>>, vector<8x1xf32>
    %c0_13 = arith.constant 0 : index
    %c13 = arith.constant 13 : index
    %19 = vector.load %arg2[%c0_13, %c13] : memref<8x128xf32, #tpu.memory_space<vmem>>, vector<8x1xf32>
    %c0_14 = arith.constant 0 : index
    %c14 = arith.constant 14 : index
    %20 = vector.load %arg2[%c0_14, %c14] : memref<8x128xf32, #tpu.memory_space<vmem>>, vector<8x1xf32>
    %c0_15 = arith.constant 0 : index
    %c15 = arith.constant 15 : index
    %21 = vector.load %arg2[%c0_15, %c15] : memref<8x128xf32, #tpu.memory_space<vmem>>, vector<8x1xf32>
    %c0_16 = arith.constant 0 : index
    %c16 = arith.constant 16 : index
    %22 = vector.load %arg2[%c0_16, %c16] : memref<8x128xf32, #tpu.memory_space<vmem>>, vector<8x1xf32>
    %c0_17 = arith.constant 0 : index
    %c0_18 = arith.constant 0 : index
    %c0_19 = arith.constant 0 : index
    %c0_20 = arith.constant 0 : index
    %23 = vector.load %arg3[%c0_17, %c0_18, %c0_19, %c0_20] : memref<1x8x8x128xf32, #tpu.memory_space<vmem>>, vector<1x1x8x128xf32>
    %24 = vector.shape_cast %23 : vector<1x1x8x128xf32> to vector<8x128xf32>
    %c0_21 = arith.constant 0 : index
    %c1_22 = arith.constant 1 : index
    %c0_23 = arith.constant 0 : index
    %c0_24 = arith.constant 0 : index
    %25 = vector.load %arg3[%c0_21, %c1_22, %c0_23, %c0_24] : memref<1x8x8x128xf32, #tpu.memory_space<vmem>>, vector<1x1x8x128xf32>
    %26 = vector.shape_cast %25 : vector<1x1x8x128xf32> to vector<8x128xf32>
    %c0_25 = arith.constant 0 : index
    %c2_26 = arith.constant 2 : index
    %c0_27 = arith.constant 0 : index
    %c0_28 = arith.constant 0 : index
    %27 = vector.load %arg3[%c0_25, %c2_26, %c0_27, %c0_28] : memref<1x8x8x128xf32, #tpu.memory_space<vmem>>, vector<1x1x8x128xf32>
    %28 = vector.shape_cast %27 : vector<1x1x8x128xf32> to vector<8x128xf32>
    %c0_29 = arith.constant 0 : index
    %c3_30 = arith.constant 3 : index
    %c0_31 = arith.constant 0 : index
    %c0_32 = arith.constant 0 : index
    %29 = vector.load %arg3[%c0_29, %c3_30, %c0_31, %c0_32] : memref<1x8x8x128xf32, #tpu.memory_space<vmem>>, vector<1x1x8x128xf32>
    %30 = vector.shape_cast %29 : vector<1x1x8x128xf32> to vector<8x128xf32>
    %c0_33 = arith.constant 0 : index
    %c4_34 = arith.constant 4 : index
    %c0_35 = arith.constant 0 : index
    %c0_36 = arith.constant 0 : index
    %31 = vector.load %arg3[%c0_33, %c4_34, %c0_35, %c0_36] : memref<1x8x8x128xf32, #tpu.memory_space<vmem>>, vector<1x1x8x128xf32>
    %32 = vector.shape_cast %31 : vector<1x1x8x128xf32> to vector<8x128xf32>
    %c0_37 = arith.constant 0 : index
    %c5_38 = arith.constant 5 : index
    %c0_39 = arith.constant 0 : index
    %c0_40 = arith.constant 0 : index
    %33 = vector.load %arg3[%c0_37, %c5_38, %c0_39, %c0_40] : memref<1x8x8x128xf32, #tpu.memory_space<vmem>>, vector<1x1x8x128xf32>
    %34 = vector.shape_cast %33 : vector<1x1x8x128xf32> to vector<8x128xf32>
    %c0_41 = arith.constant 0 : index
    %c6_42 = arith.constant 6 : index
    %c0_43 = arith.constant 0 : index
    %c0_44 = arith.constant 0 : index
    %35 = vector.load %arg3[%c0_41, %c6_42, %c0_43, %c0_44] : memref<1x8x8x128xf32, #tpu.memory_space<vmem>>, vector<1x1x8x128xf32>
    %36 = vector.shape_cast %35 : vector<1x1x8x128xf32> to vector<8x128xf32>
    %c0_45 = arith.constant 0 : index
    %c7_46 = arith.constant 7 : index
    %c0_47 = arith.constant 0 : index
    %c0_48 = arith.constant 0 : index
    %37 = vector.load %arg3[%c0_45, %c7_46, %c0_47, %c0_48] : memref<1x8x8x128xf32, #tpu.memory_space<vmem>>, vector<1x1x8x128xf32>
    %38 = vector.shape_cast %37 : vector<1x1x8x128xf32> to vector<8x128xf32>
    %39 = vector.broadcast %6 : vector<8x1xf32> to vector<8x128xf32>
    %40 = arith.mulf %39, %32 : vector<8x128xf32>
    %41 = vector.broadcast %7 : vector<8x1xf32> to vector<8x128xf32>
    %42 = arith.mulf %41, %34 : vector<8x128xf32>
    %43 = arith.addf %40, %42 : vector<8x128xf32>
    %44 = vector.broadcast %8 : vector<8x1xf32> to vector<8x128xf32>
    %45 = arith.mulf %44, %36 : vector<8x128xf32>
    %46 = arith.addf %43, %45 : vector<8x128xf32>
    %47 = vector.broadcast %15 : vector<8x1xf32> to vector<8x128xf32>
    %48 = arith.addf %46, %47 : vector<8x128xf32>
    %49 = vector.broadcast %9 : vector<8x1xf32> to vector<8x128xf32>
    %50 = arith.mulf %49, %32 : vector<8x128xf32>
    %51 = vector.broadcast %10 : vector<8x1xf32> to vector<8x128xf32>
    %52 = arith.mulf %51, %34 : vector<8x128xf32>
    %53 = arith.addf %50, %52 : vector<8x128xf32>
    %54 = vector.broadcast %11 : vector<8x1xf32> to vector<8x128xf32>
    %55 = arith.mulf %54, %36 : vector<8x128xf32>
    %56 = arith.addf %53, %55 : vector<8x128xf32>
    %57 = vector.broadcast %16 : vector<8x1xf32> to vector<8x128xf32>
    %58 = arith.addf %56, %57 : vector<8x128xf32>
    %59 = vector.broadcast %12 : vector<8x1xf32> to vector<8x128xf32>
    %60 = arith.mulf %59, %32 : vector<8x128xf32>
    %61 = vector.broadcast %13 : vector<8x1xf32> to vector<8x128xf32>
    %62 = arith.mulf %61, %34 : vector<8x128xf32>
    %63 = arith.addf %60, %62 : vector<8x128xf32>
    %64 = vector.broadcast %14 : vector<8x1xf32> to vector<8x128xf32>
    %65 = arith.mulf %64, %36 : vector<8x128xf32>
    %66 = arith.addf %63, %65 : vector<8x128xf32>
    %67 = vector.broadcast %17 : vector<8x1xf32> to vector<8x128xf32>
    %68 = arith.addf %66, %67 : vector<8x128xf32>
    %cst = arith.constant 1.000000e+00 : f32
    %69 = vector.shape_cast %5 : vector<1x128xi1> to vector<1x128xi1>
    %70 = vector.broadcast %69 : vector<1x128xi1> to vector<8x128xi1>
    %71 = vector.broadcast %cst : f32 to vector<8x128xf32>
    %72 = arith.select %70, %68, %71 : vector<8x128xi1>, vector<8x128xf32>
    %73 = tpu.reciprocal %72 {approx = true} : vector<8x128xf32> -> vector<8x128xf32>
    %74 = arith.mulf %72, %73 : vector<8x128xf32>
    %cst_49 = arith.constant 2.000000e+00 : f32
    %75 = vector.broadcast %cst_49 : f32 to vector<8x128xf32>
    %76 = arith.subf %75, %74 : vector<8x128xf32>
    %77 = arith.mulf %73, %76 : vector<8x128xf32>
    %78 = vector.broadcast %18 : vector<8x1xf32> to vector<8x128xf32>
    %79 = arith.mulf %78, %77 : vector<8x128xf32>
    %80 = vector.broadcast %19 : vector<8x1xf32> to vector<8x128xf32>
    %81 = arith.mulf %80, %77 : vector<8x128xf32>
    %82 = arith.mulf %48, %79 : vector<8x128xf32>
    %83 = arith.mulf %58, %81 : vector<8x128xf32>
    %84 = vector.broadcast %20 : vector<8x1xf32> to vector<8x128xf32>
    %85 = arith.addf %82, %84 : vector<8x128xf32>
    %86 = arith.subf %85, %28 : vector<8x128xf32>
    %87 = arith.mulf %24, %86 : vector<8x128xf32>
    %88 = vector.broadcast %21 : vector<8x1xf32> to vector<8x128xf32>
    %89 = arith.addf %83, %88 : vector<8x128xf32>
    %90 = arith.subf %89, %30 : vector<8x128xf32>
    %91 = arith.mulf %26, %90 : vector<8x128xf32>
    %92 = arith.addf %87, %91 : vector<8x128xf32>
    %93 = arith.mulf %24, %79 : vector<8x128xf32>
    %94 = arith.mulf %26, %81 : vector<8x128xf32>
    %95 = arith.mulf %24, %82 : vector<8x128xf32>
    %96 = arith.mulf %26, %83 : vector<8x128xf32>
    %97 = arith.addf %95, %96 : vector<8x128xf32>
    %cst_50 = arith.constant 0.000000e+00 : f32
    %98 = vector.broadcast %cst_50 : f32 to vector<8x128xf32>
    %99 = arith.subf %98, %97 : vector<8x128xf32>
    %100 = arith.mulf %99, %77 : vector<8x128xf32>
    %101 = vector.broadcast %6 : vector<8x1xf32> to vector<8x128xf32>
    %102 = arith.mulf %93, %101 : vector<8x128xf32>
    %103 = vector.broadcast %9 : vector<8x1xf32> to vector<8x128xf32>
    %104 = arith.mulf %94, %103 : vector<8x128xf32>
    %105 = arith.addf %102, %104 : vector<8x128xf32>
    %106 = vector.broadcast %12 : vector<8x1xf32> to vector<8x128xf32>
    %107 = arith.mulf %100, %106 : vector<8x128xf32>
    %108 = arith.addf %105, %107 : vector<8x128xf32>
    %109 = vector.broadcast %7 : vector<8x1xf32> to vector<8x128xf32>
    %110 = arith.mulf %93, %109 : vector<8x128xf32>
    %111 = vector.broadcast %10 : vector<8x1xf32> to vector<8x128xf32>
    %112 = arith.mulf %94, %111 : vector<8x128xf32>
    %113 = arith.addf %110, %112 : vector<8x128xf32>
    %114 = vector.broadcast %13 : vector<8x1xf32> to vector<8x128xf32>
    %115 = arith.mulf %100, %114 : vector<8x128xf32>
    %116 = arith.addf %113, %115 : vector<8x128xf32>
    %117 = vector.broadcast %8 : vector<8x1xf32> to vector<8x128xf32>
    %118 = arith.mulf %93, %117 : vector<8x128xf32>
    %119 = vector.broadcast %11 : vector<8x1xf32> to vector<8x128xf32>
    %120 = arith.mulf %94, %119 : vector<8x128xf32>
    %121 = arith.addf %118, %120 : vector<8x128xf32>
    %122 = vector.broadcast %14 : vector<8x1xf32> to vector<8x128xf32>
    %123 = arith.mulf %100, %122 : vector<8x128xf32>
    %124 = arith.addf %121, %123 : vector<8x128xf32>
    %125 = arith.mulf %124, %34 : vector<8x128xf32>
    %126 = arith.mulf %116, %36 : vector<8x128xf32>
    %127 = arith.subf %125, %126 : vector<8x128xf32>
    %128 = arith.mulf %108, %36 : vector<8x128xf32>
    %129 = arith.mulf %124, %32 : vector<8x128xf32>
    %130 = arith.subf %128, %129 : vector<8x128xf32>
    %131 = arith.mulf %116, %32 : vector<8x128xf32>
    %132 = arith.mulf %108, %34 : vector<8x128xf32>
    %133 = arith.subf %131, %132 : vector<8x128xf32>
    %134 = arith.mulf %127, %38 : vector<8x128xf32>
    %c0_51 = arith.constant 0 : index
    %c0_52 = arith.constant 0 : index
    %135 = vector.load %arg5[%c0_51, %c0_52] : memref<56x128xf32, #tpu.memory_space<vmem>>, vector<8x128xf32>
    tpu.vector_store %arg5[%c0_51, %c0_52], %134 {strides = array<i32>} : memref<56x128xf32, #tpu.memory_space<vmem>>, vector<8x128xf32>,
    %136 = arith.mulf %130, %38 : vector<8x128xf32>
    %c8_53 = arith.constant 8 : index
    %c0_54 = arith.constant 0 : index
    %137 = vector.load %arg5[%c8_53, %c0_54] : memref<56x128xf32, #tpu.memory_space<vmem>>, vector<8x128xf32>
    tpu.vector_store %arg5[%c8_53, %c0_54], %136 {strides = array<i32>} : memref<56x128xf32, #tpu.memory_space<vmem>>, vector<8x128xf32>,
    %138 = arith.mulf %133, %38 : vector<8x128xf32>
    %c16_55 = arith.constant 16 : index
    %c0_56 = arith.constant 0 : index
    %139 = vector.load %arg5[%c16_55, %c0_56] : memref<56x128xf32, #tpu.memory_space<vmem>>, vector<8x128xf32>
    tpu.vector_store %arg5[%c16_55, %c0_56], %138 {strides = array<i32>} : memref<56x128xf32, #tpu.memory_space<vmem>>, vector<8x128xf32>,
    %140 = arith.mulf %108, %38 : vector<8x128xf32>
    %c24 = arith.constant 24 : index
    %c0_57 = arith.constant 0 : index
    %141 = vector.load %arg5[%c24, %c0_57] : memref<56x128xf32, #tpu.memory_space<vmem>>, vector<8x128xf32>
    tpu.vector_store %arg5[%c24, %c0_57], %140 {strides = array<i32>} : memref<56x128xf32, #tpu.memory_space<vmem>>, vector<8x128xf32>,
    %142 = arith.mulf %116, %38 : vector<8x128xf32>
    %c32 = arith.constant 32 : index
    %c0_58 = arith.constant 0 : index
    %143 = vector.load %arg5[%c32, %c0_58] : memref<56x128xf32, #tpu.memory_space<vmem>>, vector<8x128xf32>
    tpu.vector_store %arg5[%c32, %c0_58], %142 {strides = array<i32>} : memref<56x128xf32, #tpu.memory_space<vmem>>, vector<8x128xf32>,
    %144 = arith.mulf %124, %38 : vector<8x128xf32>
    %c40 = arith.constant 40 : index
    %c0_59 = arith.constant 0 : index
    %145 = vector.load %arg5[%c40, %c0_59] : memref<56x128xf32, #tpu.memory_space<vmem>>, vector<8x128xf32>
    tpu.vector_store %arg5[%c40, %c0_59], %144 {strides = array<i32>} : memref<56x128xf32, #tpu.memory_space<vmem>>, vector<8x128xf32>,
    %146 = vector.broadcast %22 : vector<8x1xf32> to vector<8x128xf32>
    %147 = arith.subf %146, %92 : vector<8x128xf32>
    %148 = arith.mulf %147, %38 : vector<8x128xf32>
    %c48 = arith.constant 48 : index
    %c0_60 = arith.constant 0 : index
    %149 = vector.load %arg5[%c48, %c0_60] : memref<56x128xf32, #tpu.memory_space<vmem>>, vector<8x128xf32>
    tpu.vector_store %arg5[%c48, %c0_60], %148 {strides = array<i32>} : memref<56x128xf32, #tpu.memory_space<vmem>>, vector<8x128xf32>,
    %c0_61 = arith.constant 0 : index
    %c0_62 = arith.constant 0 : index
    %150 = vector.load %arg5[%c0_61, %c0_62] : memref<56x128xf32, #tpu.memory_space<vmem>>, vector<56x128xf32>
    %cst_63 = arith.constant dense<0.000000e+00> : vector<56x56xf32>
    %151 = tpu.matmul %150, %150, %cst_63 {dimension_numbers = #tpu.dot_dimension_numbers<[1], [1], [0], [0], [0, 0, 1, 0], [], []>} : vector<56x128xf32>, vector<56x128xf32>, vector<56x56xf32> -> vector<56x56xf32>
    %c0_i32 = arith.constant 0 : i32
    %152 = arith.cmpi eq, %arg1, %c0_i32 : i32
    %153 = arith.extui %152 : i1 to i32
    %c0_i32_64 = arith.constant 0 : i32
    %154 = arith.cmpi ne, %153, %c0_i32_64 : i32
    scf.if %154 {
      %cst_71 = arith.constant 0.000000e+00 : f32
      %161 = vector.broadcast %cst_71 : f32 to vector<1x56x56xf32>
      %c0_72 = arith.constant 0 : index
      %c0_73 = arith.constant 0 : index
      %c0_74 = arith.constant 0 : index
      %162 = vector.load %arg4[%c0_72, %c0_73, %c0_74] : memref<1x56x56xf32, #tpu.memory_space<vmem>>, vector<1x56x56xf32>
      tpu.vector_store %arg4[%c0_72, %c0_73, %c0_74], %161 {strides = array<i32>} : memref<1x56x56xf32, #tpu.memory_space<vmem>>, vector<1x56x56xf32>,
    } else {
    }
    %c0_65 = arith.constant 0 : index
    %c0_66 = arith.constant 0 : index
    %c0_67 = arith.constant 0 : index
    %155 = vector.load %arg4[%c0_65, %c0_66, %c0_67] : memref<1x56x56xf32, #tpu.memory_space<vmem>>, vector<1x56x56xf32>
    %156 = vector.shape_cast %155 : vector<1x56x56xf32> to vector<56x56xf32>
    %157 = arith.addf %156, %151 : vector<56x56xf32>
    %c0_68 = arith.constant 0 : index
    %c0_69 = arith.constant 0 : index
    %c0_70 = arith.constant 0 : index
    %158 = vector.load %arg4[%c0_68, %c0_69, %c0_70] : memref<1x56x56xf32, #tpu.memory_space<vmem>>, vector<1x56x56xf32>
    %159 = vector.shape_cast %158 : vector<1x56x56xf32> to vector<56x56xf32>
    %160 = vector.shape_cast %157 : vector<56x56xf32> to vector<1x56x56xf32>
    tpu.vector_store %arg4[%c0_68, %c0_69, %c0_70], %160 {strides = array<i32>} : memref<1x56x56xf32, #tpu.memory_space<vmem>>, vector<1x56x56xf32>,
    return
  }
  func.func @transform_0(%arg0: i32, %arg1: i32) -> (i32, i32) {
    %c0_i32 = arith.constant 0 : i32
    %c0_i32_0 = arith.constant 0 : i32
    return %arg0, %c0_i32 : i32, i32
  }
  func.func @transform_1(%arg0: i32, %arg1: i32) -> (i32, i32, i32, i32) {
    %c0_i32 = arith.constant 0 : i32
    %c0_i32_0 = arith.constant 0 : i32
    %c0_i32_1 = arith.constant 0 : i32
    return %arg0, %c0_i32, %c0_i32_0, %arg1 : i32, i32, i32, i32
  }
  func.func @transform_2(%arg0: i32, %arg1: i32) -> (i32, i32, i32) {
    %c0_i32 = arith.constant 0 : i32
    %c0_i32_0 = arith.constant 0 : i32
    %c0_i32_1 = arith.constant 0 : i32
    return %arg0, %c0_i32, %c0_i32_0 : i32, i32, i32
  }
}

</mosaic_0001>

<bundles_post_ra>
// kernel: tpu_custom_call.1
= control target key start
LH: loop header
LB: loop body
LE: loop exit
PB: predicated region body
PF: predicated region fallthrough
CT: control target
= control target key end

     0   :  { %7 = vsyncpa [#allocation4], 0  ;;  %s568_s0 = inlined_call_operand.hbm [shape: f32[8,128], index: 0, kind: input, shape index: {}]   ;;  %s569_s1 = inlined_call_operand.hbm [shape: f32[1,8,8,128], index: 1, kind: input, shape index: {}]   ;;  %s570_s2 = inlined_call_operand.hbm [shape: f32[1,56,56], index: 2, kind: output, shape index: {}]  }
   0x1   :  { %8 = vsyncpa [#allocation7], 0 }
   0x2   :  { %9 = vsyncpa [#allocation5], 0  ;;  %s15_s11 = sshll.u32 %s568_s0, 4  ;;  %s456_s12 = smov [#allocation3]   ;;  %s16_s11 = int_to_ptr.hbm [resolvable:$true] %s15_s11 }
   0x3   :  { %s17_s13 = sshll.u32 %s456_s12, 4  ;;  %s25_s16 = sshll.u32 %s569_s1, 4  ;;  %s18_s13 = int_to_ptr.vmem [resolvable:$true] %s17_s13  ;;  %s26_s16 = int_to_ptr.hbm [resolvable:$true] %s25_s16 }
   0x4   :  { %20 = dma.hbm_to_vmem [thread:$0]  %s16_s11, 128, %s18_s13, [#allocation4]  }
   0x5   :  { %s457_s17 = smov [#allocation6]   ;;  %s458_s19 = smov 128  }
   0x6   :  { %s27_s18 = sshll.u32 %s457_s17, 4  ;;  %s459_s20 = smov 8   ;;  %s28_s18 = int_to_ptr.vmem [resolvable:$true] %s27_s18 }
   0x7   :  { %33 = dma.hbm_to_vmem [thread:$0]  %s26_s16, 1024, %s28_s18, [#allocation7], %s458_s19, %s458_s19, %s459_s20  }
   0x8   :  { %450 = dma.done.wait [#allocation4], 128  }
   0x9   :  { %451 = vsyncadd [#allocation4], 4294967168 }
   0xa   :  { %452 = dma.done.wait [#allocation7], 1024  }
   0xb   :  { %453 = vsyncadd [#allocation7], 4294966272  ;;  %v460_v0 = vmov 8   ;;  %v461_v1 = vmov 6   ;;  %v462_v2 = vmov 0   ;;  %v48_v3 = vld [vmem:[#allocation3] sm:$0xff]  ;;  %v42_v23 = vlaneseq }
   0xc   :  { %360 = vset.pattern.permute.xlu1 %v460_v0  ;;  %358 = vset.pattern.permute.xlu0 %v461_v1  ;;  %v463_v4 = vmov 11   ;;  %v464_v5 = vmov 7   ;;  %v465_v6 = vmov 1   ;;  %v466_v7 = vmov 3   ;;  %v511_v22 = vld [vmem:[#allocation6 + $0x20] sm:$0xff]  ;;  %v517_v26 = vld [vmem:[#allocation6 + $0x30] sm:$0xff] }
   0xd   :  { %362 = vset.pattern.permute.xlu2 %v462_v2  ;;  %121 = vperm.xlu1 %360, %v48_v3   ;;  %v467_v8 = vmov 2   ;;  %v468_v9 = vmov 4   ;;  %v469_v10 = vmov 5   ;;  %v470_v11 = vmov 13   ;;  %v519_v27 = vld [vmem:[#allocation6 + $0x28] sm:$0xff]  ;;  %v49_v1 = vld [vmem:[#allocation6] sm:$0xff] }
   0xe   :  { %110 = vperm.xlu0 %358, %v48_v3   ;;  %66 = vperm.xlu2 %362, %v48_v3   ;;  %v471_v12 = vmov 9   ;;  %v472_v13 = vmov 10   ;;  %v473_v14 = vmov 16   ;;  %v474_v15 = vmov 12   ;;  %v51_v2 = vld [vmem:[#allocation6 + $0x8] sm:$0xff]  ;;  %s478_s0 = smov [#allocation8]  }
   0xf   :  { %v475_v16 = vmov 14   ;;  %v476_v17 = vmov 15   ;;  %v43_v31 = vand.u32 127, %v42_v23  ;;  %vm264_vm1 = vcmask 457728   ;;  %s298_s1 = sshll.u32 %s478_s0, 4  ;;  %s300_s23 = sshll.u32 %s570_s2, 4  ;;  %s299_s1 = int_to_ptr.vmem [resolvable:$true] %s298_s1  ;;  %s301_s23 = int_to_ptr.hbm [resolvable:$true] %s300_s23 }
  0x11   :  { %vm47_vm0 = vcmp.lt.s32.totalorder %v43_v31, 100 }
  0x15   :  { %361 = vset.pattern.permute.xlu1 %v463_v4 }
  0x16   :  { %359 = vset.pattern.permute.xlu0 %v464_v5  ;;  %127 = vperm.xlu1 %361, %v48_v3  }
  0x17   :  { %115 = vperm.xlu0 %359, %v48_v3   ;;  %363 = vset.pattern.permute.xlu2 %v465_v6  ;;  %v55_v6 = vld [vmem:[#allocation6 + $0x18] sm:$0xff] }
  0x18   :  { %71 = vperm.xlu2 %363, %v48_v3  }
  0x1e   :  { %364 = vset.pattern.permute.xlu1 %v466_v7 }
  0x1f   :  { %366 = vset.pattern.permute.xlu0 %v467_v8  ;;  %88 = vperm.xlu1 %364, %v48_v3   ;;  %v53_v8 = vld [vmem:[#allocation6 + $0x10] sm:$0xff] }
  0x20   :  { %77 = vperm.xlu0 %366, %v48_v3   ;;  %365 = vset.pattern.permute.xlu2 %v468_v9 }
  0x21   :  { %93 = vperm.xlu2 %365, %v48_v3  }
  0x27   :  { %367 = vset.pattern.permute.xlu1 %v469_v10 }
  0x28   :  { %371 = vset.pattern.permute.xlu0 %v470_v11  ;;  %99 = vperm.xlu1 %367, %v48_v3  }
  0x29   :  { %144 = vperm.xlu0 %371, %v48_v3   ;;  %368 = vset.pattern.permute.xlu2 %v471_v12 }
  0x2a   :  { %83 = vperm.xlu2 %368, %v48_v3  }
  0x30   :  { %369 = vset.pattern.permute.xlu1 %v472_v13 }
  0x31   :  { %375 = vset.pattern.permute.xlu0 %v473_v14  ;;  %105 = vperm.xlu1 %369, %v48_v3  }
  0x32   :  { %370 = vset.pattern.permute.xlu2 %v474_v15 }
  0x33   :  { %139 = vperm.xlu2 %370, %v48_v3  }
  0x39   :  { %372 = vset.pattern.permute.xlu1 %v475_v16 }
  0x3a   :  { %151 = vperm.xlu1 %372, %v48_v3  }
  0x3b   :  { %373 = vset.pattern.permute.xlu2 %v476_v17 }
  0x3c   :  { %158 = vperm.xlu2 %373, %v48_v3  }
  0x42   :  { %374 = vset.pattern.permute.xlu1 %v473_v14 }
  0x43   :  { %209 = vperm.xlu1 %374, %v48_v3  }
  0x68   :  { %v503_v18 = vpop.permute.xlu2 %66 }
  0x69   :  { %v69_v41 = vmul.f32 %v503_v18, %v511_v22 }
  0x72   :  { %v505_v19 = vpop.permute.xlu2 %71 }
  0x73   :  { %v74_v42 = vmul.f32 %v505_v19, %v519_v27 }
  0x75   :  { %v75_v47 = vadd.f32 %v74_v42, %v69_v41  ;;  %v63_v41 = vld [vmem:[#allocation6 + $0x38] sm:$0xff] }
  0x7b   :  { %v515_v25 = vpop.permute.xlu2 %93 }
  0x7c   :  { %v96_v48 = vmul.f32 %v515_v25, %v519_v27 }
  0x7f   :  { %v507_v20 = vpop.permute.xlu1 %121 }
  0x80   :  { %v509_v21 = vpop.permute.xlu0 %110  ;;  %v124_v32 = vmul.f32 %v507_v20, %v517_v26 }
  0x81   :  { %v113_v24 = vmul.f32 %v509_v21, %v511_v22 }
  0x84   :  { %v84_v38 = vpop.permute.xlu2 %83 }
  0x88   :  { %v128_v28 = vpop.permute.xlu1 %127 }
  0x89   :  { %v521_v29 = vpop.permute.xlu0 %115 }
  0x8a   :  { %v118_v30 = vmul.f32 %v521_v29, %v519_v27 }
  0x8c   :  { %v119_v33 = vadd.f32 %v118_v30, %v113_v24 }
  0x8d   :  { %v140_v50 = vpop.permute.xlu2 %139 }
  0x8e   :  { %v125_v34 = vadd.f32 %v124_v32, %v119_v33 }
  0x90   :  { %v130_v35 = vadd.f32 %v128_v28, %v125_v34 }
  0x91   :  { %v89_v36 = vpop.permute.xlu1 %88 }
  0x92   :  { %v133_v37 = vsel %vm47_vm0, %v130_v35, 1.0  ;;  %v78_v39 = vpop.permute.xlu0 %77  ;;  %v91_v49 = vmul.f32 %v89_v36, %v511_v22 }
  0x93   :  { %376 = vrcp.f32 %v133_v37  ;;  %v80_v44 = vmul.f32 %v78_v39, %v517_v26 }
  0x94   :  { %v97_v54 = vadd.f32 %v96_v48, %v91_v49 }
  0x95   :  { %v81_v52 = vadd.f32 %v80_v44, %v75_v47 }
  0x96   :  { %v159_v63 = vpop.permute.xlu2 %158 }
  0x97   :  { %v86_v57 = vadd.f32 %v84_v38, %v81_v52 }
  0x99   :  { %v377_v40 = vpop.eup %376 }
  0x9a   :  { %v135_v43 = vmul.f32 %v377_v40, %v133_v37  ;;  %v100_v45 = vpop.permute.xlu1 %99 }
  0x9b   :  { %v102_v53 = vmul.f32 %v100_v45, %v517_v26  ;;  %v145_v56 = vpop.permute.xlu0 %144 }
  0x9c   :  { %v136_v46 = vsub.f32 2.0, %v135_v43 }
  0x9d   :  { %v103_v58 = vadd.f32 %v102_v53, %v97_v54 }
  0x9e   :  { %v137_v51 = vmul.f32 %v377_v40, %v136_v46 }
  0xa0   :  { %v142_v55 = vmul.f32 %v140_v50, %v137_v51  ;;  %v147_v60 = vmul.f32 %v145_v56, %v137_v51 }
  0xa2   :  { %v148_v62 = vmul.f32 %v142_v55, %v86_v57  ;;  %v165_v13 = vmul.f32 %v142_v55, %v49_v1  ;;  %v166_v14 = vmul.f32 %v147_v60, %v51_v2 }
  0xa3   :  { %v106_v59 = vpop.permute.xlu1 %105 }
  0xa4   :  { %v108_v61 = vadd.f32 %v106_v59, %v103_v58  ;;  %v167_v4 = vmul.f32 %v148_v62, %v49_v1  ;;  %v182_v24 = vmul.f32 %v165_v13, %v78_v39  ;;  %v183_v28 = vmul.f32 %v166_v14, %v100_v45 }
  0xa5   :  { %v172_v32 = vmul.f32 %v165_v13, %v503_v18  ;;  %v177_v33 = vmul.f32 %v165_v13, %v505_v19  ;;  %v173_v35 = vmul.f32 %v166_v14, %v89_v36  ;;  %v178_v37 = vmul.f32 %v166_v14, %v515_v25 }
  0xa6   :  { %v149_v0 = vmul.f32 %v147_v60, %v108_v61  ;;  %v184_v38 = vadd.f32 %v183_v28, %v182_v24 }
  0xa7   :  { %v174_v45 = vadd.f32 %v173_v35, %v172_v32  ;;  %v179_v46 = vadd.f32 %v178_v37, %v177_v33 }
  0xa8   :  { %v168_v3 = vmul.f32 %v149_v0, %v51_v2  ;;  %v161_v5 = vadd.f32 %v159_v63, %v149_v0 }
  0xaa   :  { %v169_v7 = vadd.f32 %v168_v3, %v167_v4  ;;  %v162_v11 = vsub.f32 %v161_v5, %v55_v6 }
  0xac   :  { %v152_v9 = vpop.permute.xlu1 %151  ;;  %v170_v10 = vsub.f32 0.0, %v169_v7  ;;  %v163_v23 = vmul.f32 %v162_v11, %v51_v2 }
  0xad   :  { %v154_v12 = vadd.f32 %v152_v9, %v148_v62 }
  0xae   :  { %v171_v16 = vmul.f32 %v170_v10, %v137_v51 }
  0xaf   :  { %v155_v15 = vsub.f32 %v154_v12, %v53_v8 }
  0xb0   :  { %v185_v31 = vmul.f32 %v171_v16, %v507_v20  ;;  %v175_v42 = vmul.f32 %v171_v16, %v509_v21  ;;  %v180_v43 = vmul.f32 %v171_v16, %v521_v29 }
  0xb1   :  { %v156_v17 = vmul.f32 %v155_v15, %v49_v1 }
  0xb2   :  { %v186_v39 = vadd.f32 %v185_v31, %v184_v38  ;;  %v176_v18 = vadd.f32 %v175_v42, %v174_v45  ;;  %v181_v19 = vadd.f32 %v180_v43, %v179_v46 }
  0xb3   :  { %v164_v30 = vadd.f32 %v163_v23, %v156_v17 }
  0xb4   :  { %v206_v20 = vmul.f32 %v186_v39, %v63_v41  ;;  %v204_v25 = vmul.f32 %v181_v19, %v63_v41  ;;  %v193_v21 = vmul.f32 %v181_v19, %v511_v22  ;;  %v194_v29 = vmul.f32 %v176_v18, %v519_v27 }
  0xb5   :  { %v210_v34 = vpop.permute.xlu1 %209  ;;  %v202_v36 = vmul.f32 %v176_v18, %v63_v41  ;;  %v190_v48 = vmul.f32 %v176_v18, %v517_v26  ;;  %v191_v49 = vmul.f32 %v186_v39, %v511_v22  ;;  %v187_v52 = vmul.f32 %v186_v39, %v519_v27 }
  0xb6   :  { %v212_v40 = vsub.f32 %v210_v34, %v164_v30  ;;  %v195_v47 = vsub.f32 %v193_v21, %v194_v29  ;;  %v188_v53 = vmul.f32 %v181_v19, %v517_v26  ;;  %v477_v26 = vmov 0.0  }
  0xb7   :  { %v192_v51 = vsub.f32 %v190_v48, %v191_v49  ;;  %265 = vst.msk [vmem:[#allocation8] sm:$0xff] %vm264_vm1, %v477_v26 }
  0xb8   :  { %v213_v44 = vmul.f32 %v212_v40, %v63_v41  ;;  %v200_v50 = vmul.f32 %v195_v47, %v63_v41  ;;  %v189_v55 = vsub.f32 %v187_v52, %v188_v53  ;;  %266 = vst.msk [vmem:[#allocation8 + $0x8] sm:$0xff] %vm264_vm1, %v477_v26 }
  0xb9   :  { %v198_v54 = vmul.f32 %v192_v51, %v63_v41  ;;  %267 = vst.msk [vmem:[#allocation8 + $0x10] sm:$0xff] %vm264_vm1, %v477_v26 }
  0xba   :  { %231 = vmatpush.xpose.msra.mxu0 %v213_v44  ;;  %314 = vmatpush.xpose.msra.mxu1 %v213_v44  ;;  %v196_v22 = vmul.f32 %v189_v55, %v63_v41  ;;  %268 = vst.msk [vmem:[#allocation8 + $0x18] sm:$0xff] %vm264_vm1, %v477_v26 }
  0xbb   :  { %315 = vmatpush.xpose.msra.mxu2 %v213_v44  ;;  %316 = vmatpush.xpose.msra.mxu3 %v213_v44  ;;  %269 = vst.msk [vmem:[#allocation8 + $0x20] sm:$0xff] %vm264_vm1, %v477_v26 }
  0xbc   :  { %270 = vst.msk [vmem:[#allocation8 + $0x28] sm:$0xff] %vm264_vm1, %v477_v26 }
  0xbd   :  { %271 = vst.msk [vmem:[#allocation8 + $0x30] sm:$0xff] %vm264_vm1, %v477_v26 }
  0xbe   :  { %232 = vmatpush.xpose.msra.mxu0 %v206_v20  ;;  %317 = vmatpush.xpose.msra.mxu1 %v206_v20  ;;  %v272_v27 = vld [vmem:[#allocation8] sm:$0xff] }
  0xbf   :  { %318 = vmatpush.xpose.msra.mxu2 %v206_v20  ;;  %319 = vmatpush.xpose.msra.mxu3 %v206_v20  ;;  %v273_v63 = vld [vmem:[#allocation8 + $0x8] sm:$0xff] }
  0xc0   :  { %v274_v56 = vld [vmem:[#allocation8 + $0x10] sm:$0xff] }
  0xc1   :  { %v275_v61 = vld [vmem:[#allocation8 + $0x18] sm:$0xff] }
  0xc2   :  { %233 = vmatpush.xpose.msra.mxu0 %v204_v25  ;;  %320 = vmatpush.xpose.msra.mxu1 %v204_v25  ;;  %v276_v6 = vld [vmem:[#allocation8 + $0x20] sm:$0xff] }
  0xc3   :  { %321 = vmatpush.xpose.msra.mxu2 %v204_v25  ;;  %322 = vmatpush.xpose.msra.mxu3 %v204_v25  ;;  %v277_v62 = vld [vmem:[#allocation8 + $0x28] sm:$0xff] }
  0xc4   :  { %v278_v7 = vld [vmem:[#allocation8 + $0x30] sm:$0xff] }
  0xc6   :  { %234 = vmatpush.xpose.msra.mxu0 %v202_v36  ;;  %323 = vmatpush.xpose.msra.mxu1 %v202_v36 }
  0xc7   :  { %324 = vmatpush.xpose.msra.mxu2 %v202_v36  ;;  %325 = vmatpush.xpose.msra.mxu3 %v202_v36 }
  0xca   :  { %235 = vmatpush.xpose.msra.mxu0 %v200_v50  ;;  %326 = vmatpush.xpose.msra.mxu1 %v200_v50 }
  0xcb   :  { %327 = vmatpush.xpose.msra.mxu2 %v200_v50  ;;  %328 = vmatpush.xpose.msra.mxu3 %v200_v50 }
  0xce   :  { %236 = vmatpush.xpose.msra.mxu0 %v198_v54  ;;  %329 = vmatpush.xpose.msra.mxu1 %v198_v54 }
  0xcf   :  { %330 = vmatpush.xpose.msra.mxu2 %v198_v54  ;;  %331 = vmatpush.xpose.msra.mxu3 %v198_v54 }
  0xd2   :  { %237 = vmatpush.xpose.msra.mxu0 %v196_v22  ;;  %332 = vmatpush.xpose.msra.mxu1 %v196_v22 }
  0xd3   :  { %333 = vmatpush.xpose.msra.mxu2 %v196_v22  ;;  %334 = vmatpush.xpose.msra.mxu3 %v196_v22 }
  0xd5   :  { %238 = vmatmul.f32.vlgmr.msra.gmra.mxu0 %v196_v22  ;;  %244 = vmatmul.f32.vlgmr.msra.gmra.mxu1 %v200_v50 }
  0xd6   :  { %247 = vmatmul.f32.vlgmr.msra.gmra.mxu2 %v202_v36  ;;  %253 = vmatmul.f32.vlgmr.msra.gmra.mxu3 %v206_v20 }
  0xdd   :  { %241 = vmatmul.f32.gmra.mxu0 %v198_v54 }
  0xde   :  { %250 = vmatmul.f32.gmra.mxu2 %v204_v25  ;;  %256 = vmatmul.f32.gmra.mxu3 %v213_v44 }
 0x152   :  { %v239_v57 = vpop.f32.mrf.mxu0  ;;  %v245_v58 = vpop.f32.mrf.mxu1 }
 0x153   :  { %v279_v59 = vadd.f32 %v272_v27, %v239_v57  ;;  %v281_v60 = vadd.f32 %v274_v56, %v245_v58 }
 0x155   :  { %287 = vst.msk [vmem:[#allocation8] sm:$0xff] %vm264_vm1, %v279_v59 }
 0x156   :  { %289 = vst.msk [vmem:[#allocation8 + $0x10] sm:$0xff] %vm264_vm1, %v281_v60 }
 0x159   :  { %v248_v0 = vpop.f32.mrf.mxu2  ;;  %v254_v1 = vpop.f32.mrf.mxu3 }
 0x15a   :  { %v282_v2 = vadd.f32 %v275_v61, %v248_v0  ;;  %v284_v3 = vadd.f32 %v277_v62, %v254_v1  ;;  %v242_v4 = vpop.f32.mrf.mxu0 }
 0x15b   :  { %v280_v5 = vadd.f32 %v273_v63, %v242_v4 }
 0x15c   :  { %290 = vst.msk [vmem:[#allocation8 + $0x18] sm:$0xff] %vm264_vm1, %v282_v2 }
 0x15d   :  { %292 = vst.msk [vmem:[#allocation8 + $0x28] sm:$0xff] %vm264_vm1, %v284_v3 }
 0x15e   :  { %288 = vst.msk [vmem:[#allocation8 + $0x8] sm:$0xff] %vm264_vm1, %v280_v5 }
 0x161   :  { %v251_v8 = vpop.f32.mrf.mxu2  ;;  %v257_v9 = vpop.f32.mrf.mxu3 }
 0x162   :  { %v283_v10 = vadd.f32 %v276_v6, %v251_v8  ;;  %v285_v11 = vadd.f32 %v278_v7, %v257_v9 }
 0x164   :  { %291 = vst.msk [vmem:[#allocation8 + $0x20] sm:$0xff] %vm264_vm1, %v283_v10 }
 0x165   :  { %293 = vst.msk [vmem:[#allocation8 + $0x30] sm:$0xff] %vm264_vm1, %v285_v11 }
 0x166   :  { %306 = dma.vmem_to_hbm [thread:$0]  %s299_s1, 896, %s301_s23, [#allocation5], %s458_s19, %s458_s19, %s459_s20  }
 0x167   :  { %454 = dma.done.wait [#allocation5], 896  }
 0x168   :  { %455 = vsyncadd [#allocation5], 4294966400 }
 0x169   :  { %311 = vsyncpa [#allocation4], 1 }
 0x16a   :  { %312 = vsyncpa [#allocation7], 1 }
 0x16b   :  { %313 = vsyncpa [#allocation5], 1 }

</bundles_post_ra>
